<compile_context>
chip_gen: v7x
topology: tpu7x:2x2x1
jax: 0.10.0
libtpu: 0.0.40
codegen_flags: <defaults>
</compile_context>

<pallas_src>
from functools import partial

import jax
import jax.numpy as jnp
from jax.experimental import pallas as pl
from jax.experimental.pallas import tpu as pltpu


# ------------------------------ math helpers -------------------------------

def _elu(h):
    """ELU(alpha=1): h if h > 0 else exp(h) - 1, in h's dtype.

    exp overflow to +inf for large positive h lands in the discarded
    where-branch and is benign.
    """
    return jnp.where(h > 0.0, h, jnp.exp(h) - 1.0)


def _round_up(n, m):
    return ((n + m - 1) // m) * m


def _supports_bf16_act():
    """bf16 VPU/EUP exists on v6e / v7x; older chips keep activations in f32."""
    try:
        kind = jax.devices()[0].device_kind.lower()
    except Exception:
        return False
    return any(tag in kind for tag in ("v6", "v7", "7x"))


# ----------------------------- Pallas kernel -------------------------------

def fcnet_kernel(x_ref, w0_ref, b0_ref, w1_ref, b1_ref, w2_ref, b2_ref, o_ref,
                 *, act_dtype):
    # x_ref : (c_in, B_BLK) bf16   (batch on the lane axis)
    # w*    : (out, in)     bf16   (resident in VMEM across all batch tiles)
    # b*    : (out, 1)      f32
    # o_ref : (c_out, B_BLK) f32
    x = x_ref[...]

    h = jnp.dot(w0_ref[...], x, preferred_element_type=jnp.float32) + b0_ref[...]
    h = _elu(h.astype(act_dtype))

    h = jnp.dot(w1_ref[...], h.astype(jnp.bfloat16),
                preferred_element_type=jnp.float32) + b1_ref[...]
    h = _elu(h.astype(act_dtype))

    y = jnp.dot(w2_ref[...], h.astype(jnp.bfloat16),
                preferred_element_type=jnp.float32) + b2_ref[...]
    o_ref[...] = y.astype(o_ref.dtype)


@partial(jax.jit, static_argnames=("block_b", "act_bf16"))
def fcnet_forward(x, params, *, block_b=1024, act_bf16=False):
    """x: (B, channel) f32.  params: list of (W (in,out) f32, b (1,out) f32)."""
    (w0, b0), (w1, b1), (w2, b2) = params
    B, c_in = x.shape
    idim = w0.shape[1]
    c_out = w2.shape[1]

    # Batch tile: lane axis, multiple of 128 when possible.  Keep >= 2 tiles
    # whenever B >= 256 so the "parallel" grid axis feeds both v7x
    # TensorCores (and megacore on v6e); for tiny B use the full batch.
    if B < 128:
        bb = B
    else:
        bb = min(block_b, _round_up(B, 128))
        if B >= 256:
            bb = min(bb, _round_up(pl.cdiv(B, 2), 128))
        bb = max(bb, 128)
    grid = (pl.cdiv(B, bb),)   # ragged tail handled by partial-block masking

    # Lane-dense transposed operands: cast to bf16 BEFORE transposing (half
    # the bytes moved); all of this fuses under jit with the pallas_call.
    x_t = jnp.transpose(x.astype(jnp.bfloat16))                # (c_in, B)

    w0k = jnp.transpose(w0).astype(jnp.bfloat16)               # (idim, c_in)
    w1k = jnp.transpose(w1).astype(jnp.bfloat16)               # (idim, idim)
    w2k = jnp.transpose(w2).astype(jnp.bfloat16)               # (c_out, idim)
    b0k = jnp.reshape(b0, (idim, 1)).astype(jnp.float32)
    b1k = jnp.reshape(b1, (idim, 1)).astype(jnp.float32)
    b2k = jnp.reshape(b2, (c_out, 1)).astype(jnp.float32)

    const = lambda i: (0, 0)                                   # weights stay resident
    grid_spec = pltpu.PrefetchScalarGridSpec(
        num_scalar_prefetch=0,
        grid=grid,
        in_specs=[
            pl.BlockSpec((c_in, bb), lambda i: (0, i)),        # x tile
            pl.BlockSpec((idim, c_in), const),                 # W0
            pl.BlockSpec((idim, 1), const),                    # b0
            pl.BlockSpec((idim, idim), const),                 # W1
            pl.BlockSpec((idim, 1), const),                    # b1
            pl.BlockSpec((c_out, idim), const),                # W2
            pl.BlockSpec((c_out, 1), const),                   # b2
        ],
        out_specs=pl.BlockSpec((c_out, bb), lambda i: (0, i)),
    )

    act_dtype = jnp.bfloat16 if act_bf16 else jnp.float32
    y_t = pl.pallas_call(
        partial(fcnet_kernel, act_dtype=act_dtype),
        out_shape=jax.ShapeDtypeStruct((c_out, B), jnp.float32),
        grid_spec=grid_spec,
        compiler_params=pltpu.CompilerParams(
            dimension_semantics=("parallel",),                 # megacore / dual-TC
        ),
    )(x_t, w0k, b0k, w1k, b1k, w2k, b2k)

    return jnp.transpose(y_t).astype(x.dtype)                  # (B, c_out), fused under jit


# -------------------------- parameter construction -------------------------

def _spectral_normalize(w, coeff):
    """Scale W so its spectral norm is <= coeff (induced-norm Linear semantics)."""
    # TODO(synk): PyTorch uses power iteration; exact SVD-based scaling here is
    # an equivalent one-time parameter-prep step (not part of the hot path).
    sigma = jnp.linalg.norm(w, ord=2)
    factor = jnp.minimum(1.0, coeff / sigma)
    return w * factor


def make_params(key, channel=4, idim=64, nhidden=2, coeff=0.98):
    dims_in = [channel] + [idim] * nhidden
    dims_out = [idim] * nhidden + [channel]
    params = []
    for din, dout in zip(dims_in, dims_out):
        key, kw, kb = jax.random.split(key, 3)
        bound = 1.0 / jnp.sqrt(jnp.float32(din))
        w = jax.random.uniform(kw, (din, dout), jnp.float32, -bound, bound)
        w = _spectral_normalize(w, coeff)
        b = jax.random.uniform(kb, (1, dout), jnp.float32, -bound, bound)
        params.append((w, b))
    return params


# ------------------------------- reference ---------------------------------

def ref_forward(x, params, *, act_bf16=False):
    """Pure-JAX reference mirroring the kernel's precision policy
    (bf16 matmul operands, f32 accumulation, activation in act_dtype)."""
    act_dtype = jnp.bfloat16 if act_bf16 else jnp.float32
    (w0, b0), (w1, b1), (w2, b2) = params

    def mm(a, w):
        return jnp.dot(a.astype(jnp.bfloat16), w.astype(jnp.bfloat16),
                       preferred_element_type=jnp.float32)

    h = _elu((mm(x, w0) + b0).astype(act_dtype)).astype(jnp.float32)
    h = _elu((mm(h, w1) + b1).astype(act_dtype)).astype(jnp.float32)
    return mm(h, w2) + b2


# ---------------------------------- main ------------------------------------

if __name__ == "__main__":
    key = jax.random.PRNGKey(0)
    k_x, k_p = jax.random.split(key)

    B, channel, idim, nhidden = 256, 4, 64, 2
    x = jax.random.normal(k_x, (B, channel), jnp.float32)
    params = make_params(k_p, channel=channel, idim=idim, nhidden=nhidden,
                         coeff=0.98)

    act_bf16 = _supports_bf16_act()
    y = fcnet_forward(x, params, block_b=1024, act_bf16=act_bf16)
    y = jax.block_until_ready(y)

    y_ref = ref_forward(x, params, act_bf16=act_bf16)
    assert y.shape == (B, channel)
    max_err = float(jnp.max(jnp.abs(y - y_ref)))
    assert jnp.allclose(y, y_ref, atol=2e-2, rtol=2e-2), max_err

    print("KERNEL_OK")
</pallas_src>

<mosaic_0001>
module attributes {stable_mosaic.version = 11 : i64} {
  func.func @fcnet_kernel(%arg0: i32, %arg1: memref<4x128xbf16, #tpu.memory_space<vmem>>, %arg2: memref<64x4xbf16, #tpu.memory_space<vmem>>, %arg3: memref<64x1xf32, #tpu.memory_space<vmem>>, %arg4: memref<64x64xbf16, #tpu.memory_space<vmem>>, %arg5: memref<64x1xf32, #tpu.memory_space<vmem>>, %arg6: memref<4x64xbf16, #tpu.memory_space<vmem>>, %arg7: memref<4x1xf32, #tpu.memory_space<vmem>>, %arg8: memref<4x128xf32, #tpu.memory_space<vmem>>) attributes {dimension_semantics = [#tpu.dimension_semantics<parallel>], iteration_bounds = array<i64: 2>, scalar_prefetch = 0 : i64, scratch_operands = 0 : i64, tpu.core_type = #tpu.core_type<tc>, window_params = [{transform_indices = @transform_0, window_bounds = array<i64: 4, 128>}, {pipeline_mode = #tpu.pipeline_mode<synchronous>, transform_indices = @transform_1, window_bounds = array<i64: 64, 4>}, {pipeline_mode = #tpu.pipeline_mode<synchronous>, transform_indices = @transform_2, window_bounds = array<i64: 64, 1>}, {pipeline_mode = #tpu.pipeline_mode<synchronous>, transform_indices = @transform_3, window_bounds = array<i64: 64, 64>}, {pipeline_mode = #tpu.pipeline_mode<synchronous>, transform_indices = @transform_4, window_bounds = array<i64: 64, 1>}, {pipeline_mode = #tpu.pipeline_mode<synchronous>, transform_indices = @transform_5, window_bounds = array<i64: 4, 64>}, {pipeline_mode = #tpu.pipeline_mode<synchronous>, transform_indices = @transform_6, window_bounds = array<i64: 4, 1>}, {transform_indices = @transform_7, window_bounds = array<i64: 4, 128>}]} {
    %c0 = arith.constant 0 : index
    %c0_0 = arith.constant 0 : index
    %0 = vector.load %arg1[%c0, %c0_0] : memref<4x128xbf16, #tpu.memory_space<vmem>>, vector<4x128xbf16>
    %c0_1 = arith.constant 0 : index
    %c0_2 = arith.constant 0 : index
    %1 = vector.load %arg2[%c0_1, %c0_2] : memref<64x4xbf16, #tpu.memory_space<vmem>>, vector<64x4xbf16>
    %cst = arith.constant dense<0.000000e+00> : vector<64x128xf32>
    %2 = tpu.matmul %1, %0, %cst {dimension_numbers = #tpu.dot_dimension_numbers<[1], [0], [0], [1], [0, 0, 1, 1], [], []>} : vector<64x4xbf16>, vector<4x128xbf16>, vector<64x128xf32> -> vector<64x128xf32>
    %c0_3 = arith.constant 0 : index
    %c0_4 = arith.constant 0 : index
    %3 = vector.load %arg3[%c0_3, %c0_4] : memref<64x1xf32, #tpu.memory_space<vmem>>, vector<64x1xf32>
    %4 = vector.broadcast %3 : vector<64x1xf32> to vector<64x128xf32>
    %5 = arith.addf %2, %4 : vector<64x128xf32>
    %cst_5 = arith.constant 0.000000e+00 : f32
    %6 = vector.broadcast %cst_5 : f32 to vector<64x128xf32>
    %7 = arith.cmpf ogt, %5, %6 : vector<64x128xf32>
    %8 = math.exp %5 : vector<64x128xf32>
    %cst_6 = arith.constant 1.000000e+00 : f32
    %9 = vector.broadcast %cst_6 : f32 to vector<64x128xf32>
    %10 = arith.subf %8, %9 : vector<64x128xf32>
    %11 = arith.select %7, %5, %10 : vector<64x128xi1>, vector<64x128xf32>
    %c0_7 = arith.constant 0 : index
    %c0_8 = arith.constant 0 : index
    %12 = vector.load %arg4[%c0_7, %c0_8] : memref<64x64xbf16, #tpu.memory_space<vmem>>, vector<64x64xbf16>
    %13 = arith.truncf %11 : vector<64x128xf32> to vector<64x128xbf16>
    %cst_9 = arith.constant dense<0.000000e+00> : vector<64x128xf32>
    %14 = tpu.matmul %12, %13, %cst_9 {dimension_numbers = #tpu.dot_dimension_numbers<[1], [0], [0], [1], [0, 0, 1, 1], [], []>} : vector<64x64xbf16>, vector<64x128xbf16>, vector<64x128xf32> -> vector<64x128xf32>
    %c0_10 = arith.constant 0 : index
    %c0_11 = arith.constant 0 : index
    %15 = vector.load %arg5[%c0_10, %c0_11] : memref<64x1xf32, #tpu.memory_space<vmem>>, vector<64x1xf32>
    %16 = vector.broadcast %15 : vector<64x1xf32> to vector<64x128xf32>
    %17 = arith.addf %14, %16 : vector<64x128xf32>
    %cst_12 = arith.constant 0.000000e+00 : f32
    %18 = vector.broadcast %cst_12 : f32 to vector<64x128xf32>
    %19 = arith.cmpf ogt, %17, %18 : vector<64x128xf32>
    %20 = math.exp %17 : vector<64x128xf32>
    %cst_13 = arith.constant 1.000000e+00 : f32
    %21 = vector.broadcast %cst_13 : f32 to vector<64x128xf32>
    %22 = arith.subf %20, %21 : vector<64x128xf32>
    %23 = arith.select %19, %17, %22 : vector<64x128xi1>, vector<64x128xf32>
    %c0_14 = arith.constant 0 : index
    %c0_15 = arith.constant 0 : index
    %24 = vector.load %arg6[%c0_14, %c0_15] : memref<4x64xbf16, #tpu.memory_space<vmem>>, vector<4x64xbf16>
    %25 = arith.truncf %23 : vector<64x128xf32> to vector<64x128xbf16>
    %cst_16 = arith.constant dense<0.000000e+00> : vector<4x128xf32>
    %26 = tpu.matmul %24, %25, %cst_16 {dimension_numbers = #tpu.dot_dimension_numbers<[1], [0], [0], [1], [0, 0, 1, 1], [], []>} : vector<4x64xbf16>, vector<64x128xbf16>, vector<4x128xf32> -> vector<4x128xf32>
    %c0_17 = arith.constant 0 : index
    %c0_18 = arith.constant 0 : index
    %27 = vector.load %arg7[%c0_17, %c0_18] : memref<4x1xf32, #tpu.memory_space<vmem>>, vector<4x1xf32>
    %28 = vector.broadcast %27 : vector<4x1xf32> to vector<4x128xf32>
    %29 = arith.addf %26, %28 : vector<4x128xf32>
    %c0_19 = arith.constant 0 : index
    %c0_20 = arith.constant 0 : index
    %30 = vector.load %arg8[%c0_19, %c0_20] : memref<4x128xf32, #tpu.memory_space<vmem>>, vector<4x128xf32>
    tpu.vector_store %arg8[%c0_19, %c0_20], %29 {strides = array<i32>} : memref<4x128xf32, #tpu.memory_space<vmem>>, vector<4x128xf32>,
    return
  }
  func.func @transform_0(%arg0: i32) -> (i32, i32) {
    %c0_i32 = arith.constant 0 : i32
    %c0_i32_0 = arith.constant 0 : i32
    return %c0_i32, %arg0 : i32, i32
  }
  func.func @transform_1(%arg0: i32) -> (i32, i32) {
    %c0_i32 = arith.constant 0 : i32
    %c0_i32_0 = arith.constant 0 : i32
    %c0_i32_1 = arith.constant 0 : i32
    return %c0_i32, %c0_i32_0 : i32, i32
  }
  func.func @transform_2(%arg0: i32) -> (i32, i32) {
    %c0_i32 = arith.constant 0 : i32
    %c0_i32_0 = arith.constant 0 : i32
    %c0_i32_1 = arith.constant 0 : i32
    return %c0_i32, %c0_i32_0 : i32, i32
  }
  func.func @transform_3(%arg0: i32) -> (i32, i32) {
    %c0_i32 = arith.constant 0 : i32
    %c0_i32_0 = arith.constant 0 : i32
    %c0_i32_1 = arith.constant 0 : i32
    return %c0_i32, %c0_i32_0 : i32, i32
  }
  func.func @transform_4(%arg0: i32) -> (i32, i32) {
    %c0_i32 = arith.constant 0 : i32
    %c0_i32_0 = arith.constant 0 : i32
    %c0_i32_1 = arith.constant 0 : i32
    return %c0_i32, %c0_i32_0 : i32, i32
  }
  func.func @transform_5(%arg0: i32) -> (i32, i32) {
    %c0_i32 = arith.constant 0 : i32
    %c0_i32_0 = arith.constant 0 : i32
    %c0_i32_1 = arith.constant 0 : i32
    return %c0_i32, %c0_i32_0 : i32, i32
  }
  func.func @transform_6(%arg0: i32) -> (i32, i32) {
    %c0_i32 = arith.constant 0 : i32
    %c0_i32_0 = arith.constant 0 : i32
    %c0_i32_1 = arith.constant 0 : i32
    return %c0_i32, %c0_i32_0 : i32, i32
  }
  func.func @transform_7(%arg0: i32) -> (i32, i32) {
    %c0_i32 = arith.constant 0 : i32
    %c0_i32_0 = arith.constant 0 : i32
    return %c0_i32, %arg0 : i32, i32
  }
}

</mosaic_0001>

<bundles_post_ra>
// kernel: fcnet_forward.1
= control target key start
LH: loop header
LB: loop body
LE: loop exit
PB: predicated region body
PF: predicated region fallthrough
CT: control target
= control target key end

     0   :  { %12 = vsyncpa [#allocation3], 0  ;;  %s1284_s0 = inlined_call_operand.vmem [shape: bf16[4,256], index: 0, kind: input, shape index: {}]   ;;  %s1285_s1 = inlined_call_operand.vmem [shape: bf16[64,4], index: 1, kind: input, shape index: {}]   ;;  %s1286_s2 = inlined_call_operand.vmem [shape: f32[64,1], index: 2, kind: input, shape index: {}]   ;;  %s1287_s3 = inlined_call_operand.vmem [shape: bf16[64,64], index: 3, kind: input, shape index: {}]   ;;  %s1288_s4 = inlined_call_operand.vmem [shape: f32[64,1], index: 4, kind: input, shape index: {}]   ;;  %s1289_s5 = inlined_call_operand.vmem [shape: bf16[4,64], index: 5, kind: input, shape index: {}]   ;;  %s1290_s6 = inlined_call_operand.vmem [shape: f32[4,1], index: 6, kind: input, shape index: {}]   ;;  %s1291_s7 = inlined_call_operand.hbm [shape: f32[4,256], index: 7, kind: output, shape index: {}]  }
   0x1   :  { %14 = vsyncpa [#allocation3 + $0x1], 0  ;;  %s1092_s24 = smov 0   ;;  %s1094_s25 = smov 0  }
   0x2   :  { %s1096_s26 = smov 0   ;;  %s1098_s27 = smov 0  }
   0x3 LB: > { %s1113_s28 = sadd.s32 4294967295, %s1046_s27   ;;  %s800_s29 = sadd.s32 4294967294, %s1046_s27   ;;  %s1046_s27 = sphi %s1098_s27, %s1297_s27   ;;  %s1042_s26 = sphi %s1096_s26, %s1296_s26   ;;  %s1038_s25 = sphi %s1094_s25, %s1295_s25   ;;  %s1034_s24 = sphi %s1092_s24, %s1294_s24  }
   0x4   : > { %s1117_s30 = sadd.s32 1, %s1046_s27   ;;  %s179_s8 = sadd.s32 1, %s1042_s26 }
   0x5   : > { %s176_s9 = ssub.s32 %s1046_s27, %s1117_s30  ;;  %p189_p0 = scmp.ne.s32.totalorder %s1042_s26, %s1038_s25 }
   0x6   : > { %p177_p1 = scmp.eq.s32.totalorder %s176_s9, 0  ;;  %p190_p2 = scmp.eq.s32.totalorder %s1113_s28, 1 }
   0x7   : > { %p195_p3 = scmp.ne.s32.totalorder %s1038_s25, %s1034_s24  ;;  %p196_p4 = scmp.eq.s32.totalorder %s800_s29, 1 }
   0x8   : > { %s1128_s10 = scalar_select %p177_p1, %s1042_s26, %s179_s8  }
   0x9   : > { %p1130_p5 = por %p190_p2, %p189_p0  ;;  %p1134_p6 = por %p196_p4, %p195_p3 }
   0xa   : > { %p803_p7 = scmp.ge.s32.totalorder %s1046_s27, 1  ;;  %p239_p8 = scmp.lt.s32.totalorder %s1046_s27, 3 }
   0xc   : > { %p240_p9 = pnand %p803_p7, %p239_p8 }
   0xd   : > { %p270_p10 = scmp.lt.s32.totalorder (!%p240_p9), %s1113_s28, 1  ;;  %v944_v0 = vld [vmem:[%s1285_s1] sm:$0xff] (!%p240_p9)   ;;  %vm352_vm0 = vcmask (!%p240_p9), 31744   ;;  %vm365_vm1 = vcmask (!%p240_p9), 1041408   ;;  %v1048_v1 = vmov (!%p240_p9), 0   ;;  %v286_v3 = vld [vmem:[%s1286_s2 + $0x10] sm:$0xff] (!%p240_p9) }
   0xe   : > { %243 = sbr.rel (%p240_p9) target bundleno = 759 (0x2f7), region = 48  ;;  %863 = vmatprep.mubr.msk.bf16.mxu0 (!%p240_p9), %vm352_vm0, %v944_v0  ;;  %942 = vset.pattern.permute.xlu0 (!%p240_p9), %v1048_v1  ;;  %v284_v2 = vld [vmem:[%s1286_s2] sm:$0xff] (!%p240_p9)  ;;  %v285_v5 = vld [vmem:[%s1286_s2 + $0x8] sm:$0xff] (!%p240_p9)  ;;  %v287_v8 = vld [vmem:[%s1286_s2 + $0x18] sm:$0xff] (!%p240_p9)  ;;  %vm554_vm2 = vcmask (!%p240_p9), 523264   ;;  %vm1050_vm11 = vmmov (!%p240_p9), 0  }
   0xf   : > { %943 = vset.pattern.permute.xlu1 (!%p240_p9), %v1048_v1  ;;  %294 = vperm.xlu0 (!%p240_p9), %942, %v284_v2   ;;  %v945_v7 = vld [vmem:[%s1285_s1 + $0x8] sm:$0xff] (!%p240_p9)   ;;  %v946_v9 = vld [vmem:[%s1285_s1 + $0x10] sm:$0xff] (!%p240_p9)   ;;  %v288_v10 = vld [vmem:[%s1286_s2 + $0x20] sm:$0xff] (!%p240_p9)  ;;  %s267_s14 = sand.u32 (!%p240_p9), 1, %s1038_s25   ;;  %s1051_s23 = smov (!%p240_p9), [#allocation2]  }
  0x10   : > { %304 = vperm.xlu1 (!%p240_p9), %943, %v286_v3   ;;  %v289_v11 = vld [vmem:[%s1286_s2 + $0x28] sm:$0xff] (!%p240_p9)  ;;  %v290_v12 = vld [vmem:[%s1286_s2 + $0x30] sm:$0xff] (!%p240_p9)  ;;  %v947_v13 = vld [vmem:[%s1285_s1 + $0x18] sm:$0xff] (!%p240_p9)   ;;  %s988_s29 = sshll.u32 (!%p240_p9), %s1051_s23, 4  ;;  %s989_s29 = int_to_ptr.vmem [resolvable:$false] %s988_s29 }
  0x11   : > { %v291_v14 = vld [vmem:[%s1286_s2 + $0x38] sm:$0xff] (!%p240_p9)  ;;  %v486_v15 = vld [vmem:[%s1288_s4] sm:$0xff] (!%p240_p9)  ;;  %v487_v16 = vld [vmem:[%s1288_s4 + $0x8] sm:$0xff] (!%p240_p9)  ;;  %s990_s8 = scalar_lea.vmem (!%p240_p9), %s989_s29, 128 }
  0x12   : > { %v488_v17 = vld [vmem:[%s1288_s4 + $0x10] sm:$0xff] (!%p240_p9)  ;;  %v489_v18 = vld [vmem:[%s1288_s4 + $0x18] sm:$0xff] (!%p240_p9)  ;;  %v490_v19 = vld [vmem:[%s1288_s4 + $0x20] sm:$0xff] (!%p240_p9) }
  0x13   : > { %299 = vperm.xlu0 (!%p240_p9), %942, %v285_v5   ;;  %v491_v20 = vld [vmem:[%s1288_s4 + $0x28] sm:$0xff] (!%p240_p9)  ;;  %v492_v21 = vld [vmem:[%s1288_s4 + $0x30] sm:$0xff] (!%p240_p9)  ;;  %v493_v22 = vld [vmem:[%s1288_s4 + $0x38] sm:$0xff] (!%p240_p9) }
  0x14   : > { %309 = vperm.xlu1 (!%p240_p9), %943, %v287_v8   ;;  %v677_v23 = vld [vmem:[%s1290_s6] sm:$0xf] (!%p240_p9) }
  0x15   : > { %s271_s15 = scalar_select %p270_p10, %s1113_s28, 1  ;;  %v948_v24 = vld [vmem:[%s1287_s3] sm:$0xff]  }
  0x16   : > { %879 = vmatprep.mubr.msk.bf16.mxu1 %vm554_vm2, %v948_v24  ;;  %v1049_v24 = vmov 0.0  }
  0x17   : > { %s805_s16 = sshll.u32 %s271_s15, 1  ;;  %314 = vperm.xlu0 %942, %v288_v10   ;;  %s804_s15 = sshll.u32 %s267_s14, 2 }
  0x18   : > { %s273_s21 = scalar_lea.vmem %s1284_s0, %s805_s16  ;;  %319 = vperm.xlu1 %943, %v289_v11   ;;  %s840_s16 = sshll.u32 %s1113_s28, 6 }
  0x19   : > { %v275_v4 = vld [vmem:[%s273_s21] sm:$0x3]  ;;  %s269_s17 = scalar_lea.vmem [#allocation2], %s804_s15  ;;  %s1242_s21 = scalar_lea.hbm %s1291_s7, %s840_s16 }
  0x1a   : > { %899 = vmatprep.subr.msk.bf16.mxu0 %vm365_vm1, %v275_v4  ;;  %v367_v6 = vsel %vm365_vm1, %v275_v4, 0  ;;  %s741_s18 = sshll.u32 %s269_s17, 4  ;;  %s728_s28 = scalar_lea.sflag [#allocation3], %s267_s14  ;;  %s1244_s18 = int_to_ptr.vmem [resolvable:$true] %s741_s18 }
  0x1b   : > { %862 = vmatpush3.bf16.msra.mxu0 %v367_v6  ;;  %324 = vperm.xlu0 %942, %v290_v12   ;;  %s984_s22 = scalar_lea.vmem %s1244_s18, 64  ;;  %p991_p0 = scmp.lt.s32.totalorder %s1244_s18, %s989_s29 }
  0x1c   : > { %329 = vperm.xlu1 %943, %v291_v14   ;;  %887 = vmatprep.subr.bf16.mxu0 %v1049_v24  ;;  %p985_p11 = scmp.ne.s32.totalorder %s1244_s18, %s984_s22  ;;  %p992_p1 = scmp.lt.s32.totalorder %s990_s8, %s984_s22 }
  0x1e   : > { %864 = vmatmul.mubr.msk.bf16.vlgmr.msra.gmra.mrb[0].mxu0 %vm352_vm0, %v945_v7  ;;  %p986_p12 = pnand %p985_p11, %p1130_p5  ;;  %p993_p2 = por %p992_p1, %p991_p0 }
  0x1f   : > { %867 = vmatprep.mubr.msk.bf16.mxu0 %vm352_vm0, %v946_v9  ;;  %496 = vperm.xlu0 %942, %v486_v15  }
  0x20   : > { %501 = vperm.xlu1 %943, %v487_v16   ;;  %p987_p13 = pneg %p986_p12 }
  0x22   : > { %p994_p3 = pnand %p993_p2, %p987_p13 }
  0x23   : > { %506 = vperm.xlu0 %942, %v488_v17  }
  0x24   : > { %511 = vperm.xlu1 %943, %v489_v18  }
  0x26   : > { %868 = vmatmul.mubr.msk.bf16.gmra.mrb[4].mxu0 %vm352_vm0, %v947_v13 }
  0x27   : > { %516 = vperm.xlu0 %942, %v490_v19   ;;  %895 = vmatprep.mubr.msk.bf16.mxu0 %vm1050_vm11, %v1049_v24 }
  0x28   : > { %521 = vperm.xlu1 %943, %v491_v20  }
  0x2b   : > { %526 = vperm.xlu0 %942, %v492_v21   ;;  %v949_v21 = vld [vmem:[%s1287_s3 + $0x8] sm:$0xff]  }
  0x2c   : > { %531 = vperm.xlu1 %943, %v493_v22   ;;  %v950_v22 = vld [vmem:[%s1287_s3 + $0x10] sm:$0xff]  }
  0x2f   : > { %680 = vperm.xlu0 %942, %v677_v23   ;;  %v951_v23 = vld [vmem:[%s1287_s3 + $0x18] sm:$0xff]  }
  0x8e   : > { %v295_v25 = vpop.permute.xlu0 %294 }
  0x8f   : > { %v305_v26 = vpop.permute.xlu1 %304 }
  0x92   : > { %v300_v27 = vpop.permute.xlu0 %299 }
  0x93   : > { %v310_v28 = vpop.permute.xlu1 %309 }
  0x96   : > { %v315_v32 = vpop.permute.xlu0 %314 }
  0x97   : > { %v320_v38 = vpop.permute.xlu1 %319 }
  0x9a   : > { %v325_v43 = vpop.permute.xlu0 %324 }
  0x9b   : > { %v330_v47 = vpop.permute.xlu1 %329 }
  0xf1   : > { %v865_v29 = vpop.f32.mrb[0].mxu0 }
  0xf2   : > { %v412_v30 = vadd.f32 %v865_v29, %v305_v26  ;;  %v403_v31 = vpop.f32.mrb[1].mxu0  ;;  %v502_v26 = vpop.permute.xlu1 %501 }
  0xf3   : > { %v404_v33 = vadd.f32 %v403_v31, %v295_v25  ;;  %v866_v34 = vpop.f32.mrb[2].mxu0  ;;  %v497_v25 = vpop.permute.xlu0 %496 }
  0xf4   : > { %v446_v35 = vmul.f32 1.442695, %v412_v30  ;;  %v415_v36 = vadd.f32 %v866_v34, %v310_v28  ;;  %v406_v37 = vpop.f32.mrb[3].mxu0  ;;  %vm436_vm3 = vcmp.gt.f32.partialorder %v412_v30, 0.0 }
  0xf5   : > { %v442_v39 = vmul.f32 1.442695, %v404_v33  ;;  %v407_v40 = vadd.f32 %v406_v37, %v300_v27  ;;  %vm434_vm5 = vcmp.gt.f32.partialorder %v404_v33, 0.0 }
  0xf6   : > { %952 = vpow2.f32 %v446_v35  ;;  %v448_v41 = vmul.f32 1.442695, %v415_v36  ;;  %vm437_vm4 = vcmp.gt.f32.partialorder %v415_v36, 0.0  ;;  %v512_v28 = vpop.permute.xlu1 %511 }
  0xf7   : > { %954 = vpow2.f32 %v442_v39  ;;  %v444_v42 = vmul.f32 1.442695, %v407_v40  ;;  %vm435_vm6 = vcmp.gt.f32.partialorder %v407_v40, 0.0  ;;  %v507_v27 = vpop.permute.xlu0 %506 }
  0xf8   : > { %956 = vpow2.f32 %v448_v41 }
  0xf9   : > { %958 = vpow2.f32 %v444_v42  ;;  %v869_v44 = vpop.f32.mrb[4].mxu0 }
  0xfa   : > { %v428_v45 = vadd.f32 %v869_v44, %v325_v43  ;;  %v419_v46 = vpop.f32.mrb[5].mxu0 }
  0xfb   : > { %v420_v48 = vadd.f32 %v419_v46, %v315_v32  ;;  %v870_v49 = vpop.f32.mrb[6].mxu0  ;;  %v517_v32 = vpop.permute.xlu0 %516 }
  0xfc   : > { %v454_v50 = vmul.f32 1.442695, %v428_v45  ;;  %v431_v51 = vadd.f32 %v870_v49, %v330_v47  ;;  %v422_v52 = vpop.f32.mrb[7].mxu0  ;;  %vm440_vm7 = vcmp.gt.f32.partialorder %v428_v45, 0.0 }
  0xfd   : > { %v450_v53 = vmul.f32 1.442695, %v420_v48  ;;  %v423_v54 = vadd.f32 %v422_v52, %v320_v38  ;;  %vm438_vm9 = vcmp.gt.f32.partialorder %v420_v48, 0.0  ;;  %v522_v38 = vpop.permute.xlu1 %521 }
  0xfe   : > { %960 = vpow2.f32 %v454_v50  ;;  %v456_v55 = vmul.f32 1.442695, %v431_v51  ;;  %vm441_vm8 = vcmp.gt.f32.partialorder %v431_v51, 0.0 }
  0xff   : > { %962 = vpow2.f32 %v450_v53  ;;  %v452_v56 = vmul.f32 1.442695, %v423_v54  ;;  %vm439_vm10 = vcmp.gt.f32.partialorder %v423_v54, 0.0  ;;  %v527_v43 = vpop.permute.xlu0 %526 }
 0x100   : > { %v953_v57 = vpop.eup %952  ;;  %964 = vpow2.f32 %v456_v55 }
 0x101   : > { %v955_v58 = vpop.eup %954  ;;  %v816_v59 = vadd.f32 -1.0, %v953_v57  ;;  %966 = vpow2.f32 %v452_v56  ;;  %v532_v47 = vpop.permute.xlu1 %531 }
 0x102   : > { %v957_v60 = vpop.eup %956  ;;  %v814_v61 = vadd.f32 -1.0, %v955_v58 }
 0x103   : > { %v959_v62 = vpop.eup %958  ;;  %v817_v63 = vadd.f32 -1.0, %v957_v60  ;;  %v468_v1 = vsel %vm436_vm3, %v412_v30, %v816_v59 }
 0x104   : > { %v815_v0 = vadd.f32 -1.0, %v959_v62  ;;  %v466_v3 = vsel %vm434_vm5, %v404_v33, %v814_v61 }
 0x105   : > { %v469_v2 = vsel %vm437_vm4, %v415_v36, %v817_v63 }
 0x106   : > { %v467_v4 = vsel %vm435_vm6, %v407_v40, %v815_v0  ;;  %v483_v5 = vpack.c.bf16 %v469_v2, %v468_v1 }
 0x107   : > { %v482_v6 = vpack.c.bf16 %v467_v4, %v466_v3 }
 0x108   : > { %v961_v7 = vpop.eup %960 }
 0x109   : > { %v963_v8 = vpop.eup %962  ;;  %v820_v9 = vadd.f32 -1.0, %v961_v7  ;;  %871 = vmatprep.subr.bf16.mxu1 %v482_v6 }
 0x10a   : > { %v965_v10 = vpop.eup %964  ;;  %v818_v11 = vadd.f32 -1.0, %v963_v8  ;;  %872 = vmatpush3.bf16.msra.mxu1 %v482_v6 }
 0x10b   : > { %v967_v12 = vpop.eup %966  ;;  %v821_v13 = vadd.f32 -1.0, %v965_v10  ;;  %873 = vmatprep.subr.bf16.mxu1 %v483_v5  ;;  %v472_v15 = vsel %vm440_vm7, %v428_v45, %v820_v9 }
 0x10c   : > { %v819_v14 = vadd.f32 -1.0, %v967_v12  ;;  %v470_v17 = vsel %vm438_vm9, %v420_v48, %v818_v11 }
 0x10d   : > { %v473_v16 = vsel %vm441_vm8, %v431_v51, %v821_v13 }
 0x10e   : > { %874 = vmatpush3.bf16.msra.mxu1 %v483_v5  ;;  %v471_v18 = vsel %vm439_vm10, %v423_v54, %v819_v14  ;;  %v485_v19 = vpack.c.bf16 %v473_v16, %v472_v15 }
 0x10f   : > { %v484_v20 = vpack.c.bf16 %v471_v18, %v470_v17 }
 0x111   : > { %875 = vmatprep.subr.bf16.mxu1 %v484_v20 }
 0x112   : > { %876 = vmatpush3.bf16.msra.mxu1 %v484_v20 }
 0x113   : > { %877 = vmatprep.subr.bf16.mxu1 %v485_v19 }
 0x116   : > { %878 = vmatpush3.bf16.msra.mxu1 %v485_v19 }
 0x119   : > { %880 = vmatmul.mubr.msk.bf16.vlgmr.msra.gmra.mrb[0].mxu1 %vm554_vm2, %v949_v21  ;;  %v672_v21 = vld [vmem:[%s1289_s5] sm:$0x3] }
 0x11a   : > { %883 = vmatprep.mubr.msk.bf16.mxu1 %vm554_vm2, %v950_v22  ;;  %v681_v22 = vpop.permute.xlu0 %680 }
 0x121   : > { %884 = vmatmul.mubr.msk.bf16.gmra.mrb[4].mxu1 %vm554_vm2, %v951_v23 }
 0x1ec   : > { %v881_v29 = vpop.f32.mrb[0].mxu1 }
 0x1ed   : > { %v610_v30 = vadd.f32 %v881_v29, %v507_v27  ;;  %v601_v31 = vpop.f32.mrb[1].mxu1 }
 0x1ee   : > { %v602_v33 = vadd.f32 %v601_v31, %v497_v25  ;;  %v882_v34 = vpop.f32.mrb[2].mxu1 }
 0x1ef   : > { %v644_v35 = vmul.f32 1.442695, %v610_v30  ;;  %v613_v36 = vadd.f32 %v882_v34, %v512_v28  ;;  %v604_v37 = vpop.f32.mrb[3].mxu1  ;;  %vm634_vm12 = vcmp.gt.f32.partialorder %v610_v30, 0.0 }
 0x1f0   : > { %v640_v39 = vmul.f32 1.442695, %v602_v33  ;;  %v605_v40 = vadd.f32 %v604_v37, %v502_v26  ;;  %vm632_vm14 = vcmp.gt.f32.partialorder %v602_v33, 0.0 }
 0x1f1   : > { %968 = vpow2.f32 %v644_v35  ;;  %v646_v41 = vmul.f32 1.442695, %v613_v36  ;;  %vm635_vm13 = vcmp.gt.f32.partialorder %v613_v36, 0.0 }
 0x1f2   : > { %970 = vpow2.f32 %v640_v39  ;;  %v642_v42 = vmul.f32 1.442695, %v605_v40  ;;  %vm633_vm15 = vcmp.gt.f32.partialorder %v605_v40, 0.0 }
 0x1f3   : > { %972 = vpow2.f32 %v646_v41 }
 0x1f4   : > { %974 = vpow2.f32 %v642_v42  ;;  %v885_v44 = vpop.f32.mrb[4].mxu1 }
 0x1f5   : > { %v626_v45 = vadd.f32 %v885_v44, %v527_v43  ;;  %v617_v46 = vpop.f32.mrb[5].mxu1 }
 0x1f6   : > { %v618_v48 = vadd.f32 %v617_v46, %v517_v32  ;;  %v886_v49 = vpop.f32.mrb[6].mxu1 }
 0x1f7   : > { %v652_v50 = vmul.f32 1.442695, %v626_v45  ;;  %v629_v51 = vadd.f32 %v886_v49, %v532_v47  ;;  %v620_v52 = vpop.f32.mrb[7].mxu1  ;;  %vm638_vm0 = vcmp.gt.f32.partialorder %v626_v45, 0.0 }
 0x1f8   : > { %v648_v53 = vmul.f32 1.442695, %v618_v48  ;;  %v621_v54 = vadd.f32 %v620_v52, %v522_v38  ;;  %vm636_vm3 = vcmp.gt.f32.partialorder %v618_v48, 0.0 }
 0x1f9   : > { %976 = vpow2.f32 %v652_v50  ;;  %v654_v55 = vmul.f32 1.442695, %v629_v51  ;;  %vm639_vm1 = vcmp.gt.f32.partialorder %v629_v51, 0.0 }
 0x1fa   : > { %978 = vpow2.f32 %v648_v53  ;;  %v650_v56 = vmul.f32 1.442695, %v621_v54  ;;  %vm637_vm4 = vcmp.gt.f32.partialorder %v621_v54, 0.0 }
 0x1fb   : > { %v969_v57 = vpop.eup %968  ;;  %980 = vpow2.f32 %v654_v55 }
 0x1fc   : > { %v971_v58 = vpop.eup %970  ;;  %v832_v59 = vadd.f32 -1.0, %v969_v57  ;;  %982 = vpow2.f32 %v650_v56 }
 0x1fd   : > { %v973_v60 = vpop.eup %972  ;;  %v830_v61 = vadd.f32 -1.0, %v971_v58 }
 0x1fe   : > { %v975_v62 = vpop.eup %974  ;;  %v833_v63 = vadd.f32 -1.0, %v973_v60  ;;  %v666_v1 = vsel %vm634_vm12, %v610_v30, %v832_v59 }
 0x1ff   : > { %v831_v0 = vadd.f32 -1.0, %v975_v62  ;;  %v664_v3 = vsel %vm632_vm14, %v602_v33, %v830_v61 }
 0x200   : > { %v667_v2 = vsel %vm635_vm13, %v613_v36, %v833_v63 }
 0x201   : > { %v674_v4 = vpack.c.bf16 %v667_v2, %v666_v1  ;;  %v665_v5 = vsel %vm633_vm15, %v605_v40, %v831_v0 }
 0x202   : > { %v673_v6 = vpack.c.bf16 %v665_v5, %v664_v3 }
 0x203   : > { %v977_v7 = vpop.eup %976 }
 0x204   : > { %v979_v8 = vpop.eup %978  ;;  %v836_v9 = vadd.f32 -1.0, %v977_v7  ;;  %888 = vmatpush3.bf16.msra.mxu0 %v673_v6 }
 0x205   : > { %v981_v10 = vpop.eup %980  ;;  %v834_v11 = vadd.f32 -1.0, %v979_v8  ;;  %889 = vmatprep.subr.bf16.mxu0 %v1049_v24 }
 0x206   : > { %v983_v12 = vpop.eup %982  ;;  %v837_v13 = vadd.f32 -1.0, %v981_v10  ;;  %v670_v15 = vsel %vm638_vm0, %v626_v45, %v836_v9 }
 0x207   : > { %v835_v14 = vadd.f32 -1.0, %v983_v12  ;;  %v668_v17 = vsel %vm636_vm3, %v618_v48, %v834_v11 }
 0x208   : > { %v671_v16 = vsel %vm639_vm1, %v629_v51, %v837_v13  ;;  %890 = vmatpush3.bf16.msra.mxu0 %v674_v4 }
 0x209   : > { %v676_v18 = vpack.c.bf16 %v671_v16, %v670_v15  ;;  %v669_v19 = vsel %vm637_vm4, %v621_v54, %v835_v14  ;;  %891 = vmatprep.subr.bf16.mxu0 %v1049_v24 }
 0x20a   : > { %v675_v20 = vpack.c.bf16 %v669_v19, %v668_v17 }
 0x20c   : > { %892 = vmatpush3.bf16.msra.mxu0 %v675_v20 }
 0x20d   : > { %893 = vmatprep.subr.bf16.mxu0 %v1049_v24 }
 0x210   : > { %894 = vmatpush3.bf16.msra.mxu0 %v676_v18 }
 0x213   : > { %896 = vmatmul.mubr.msk.bf16.vlgmr.msra.gmra.mrb[8].mxu0 %vm554_vm2, %v672_v21 }
 0x2e6   : > { %v720_v23 = vpop.f32.mrb[8].mxu0 }
 0x2e7   : > { %v721_v25 = vadd.f32 %v720_v23, %v681_v22  ;;  %v897_v26 = vpop.f32.mrb[9].mxu0 }
 0x2e8   : > { %v723_v24 = vpop.f32.mrb[10].mxu0 }
 0x2e9   : > { %726 = vst [vmem:[%s269_s17] sm:$0xf] %v721_v25  ;;  %v898_v27 = vpop.f32.mrb[11].mxu0 }
 0x2ea   : > { %997 = shalt.err (!%p994_p3)
}
 0x2eb   : > { %s998_s9 = scalar_lea.hbm %s1242_s21, 64  ;;  %s1002_s15 = scalar_lea.hbm %s1291_s7, 128 }
 0x2ec   : > { %p999_p4 = scmp.ne.s32.totalorder %s1242_s21, %s998_s9  ;;  %p1003_p9 = scmp.lt.u32.totalorder %s1242_s21, %s1291_s7 }
 0x2ed   : > { %p1004_p10 = scmp.lt.u32.totalorder %s1002_s15, %s998_s9  ;;  %p1006_p12 = scmp.lt.u32.totalorder %s998_s9, %s1242_s21 }
 0x2ee   : > { %p1000_p7 = pnand %p999_p4, %p1130_p5 }
 0x2ef   : > { %p1005_p11 = por %p1004_p10, %p1003_p9 }
 0x2f0   : > { %p1001_p8 = pneg %p1000_p7 }
 0x2f1   : > { %p1007_p13 = por %p1006_p12, %p1005_p11 }
 0x2f3   : > { %p1008_p0 = pnand %p1007_p13, %p1001_p8 }
 0x2f5   : > { %1011 = shalt.err (!%p1008_p0)
}
 0x2f6   : > { %900 = dma.vmem_to_hbm [thread:$0]  (%p1130_p5), %s1244_s18, 64, %s1242_s21, %s728_s28  }
 0x2f7 PF: > { %p906_p1 = scmp.ge.s32.totalorder %s1046_s27, 2  ;;  %s753_s19 = sand.u32 1, %s1034_s24  }
 0x2f8   : > { %s754_s20 = scalar_lea.sflag [#allocation3], %s753_s19 }
 0x2f9   : > { %p903_p2 = pnand %p906_p1, %p1134_p6 }
 0x2fb   : > { %1029 = dma.done.wait (!%p903_p2), %s754_s20, 64  }
 0x2fc   : > { %1031 = vsyncadd (!%p903_p2), %s754_s20, 4294967232  ;;  %p17_p3 = scmp.ge.s32.totalorder %s1117_s30, 4   ;;  %s1294_s24 = smov %s1038_s25 }
 0x2fd   : > { %s1295_s25 = smov %s1042_s26  ;;  %s1296_s26 = smov %s1128_s10 }
 0x2fe   : > { %s1297_s27 = smov %s1117_s30  ;;  %19 = sbr.rel (!%p17_p3) target bundleno = 3 (0x3), region = 83 }
 0x305   :  { %759 = vsyncpa [#allocation3], 1 }
 0x306   :  { %761 = vsyncpa [#allocation3 + $0x1], 1 }

</bundles_post_ra>
